<compile_context>
chip_gen: v6e
topology: v6e:2x2x1
jax: 0.10.0
libtpu: 0.0.40
codegen_flags: <defaults>
</compile_context>

<pallas_src>
import functools

import jax
import jax.numpy as jnp
from jax.experimental import pallas as pl
from jax.experimental.pallas import tpu as pltpu

LANES = 128
SUBLANES = 8
TARGET_BLOCK_BYTES = 4 * 1024 * 1024   # ~4 MiB per input block


def _cdiv(a, b):
    return -(-a // b)


def _num_tensorcores():
    """2 on v7x-class parts (2 TensorCores / chip), else 1 (v5e / v6e)."""
    try:
        kind = jax.devices()[0].device_kind.lower()
    except Exception:
        return 1
    return 2 if ("v7" in kind or "7x" in kind) else 1


def _mse_kernel(x_ref, y_ref, o_ref, *, rows, block_rows, blocks_per_core,
                need_mask):
    c = pl.program_id(0)
    k = pl.program_id(1)

    # Zero this core's resident partial-sum accumulator at the start of its
    # sweep over the reduction (k) axis.
    @pl.when(k == 0)
    def _():
        o_ref[...] = jnp.zeros_like(o_ref)

    # In-kernel upcast: 16-bit inputs stream half the HBM bytes.
    d = x_ref[...].astype(jnp.float32) - y_ref[...].astype(jnp.float32)
    dd = d * d

    def _accumulate(vals):
        # Pure-VPU partial reduction into a vreg-shaped (8, 128) accumulator.
        partial = jnp.sum(
            vals.reshape(block_rows // SUBLANES, SUBLANES, LANES), axis=0)
        o_ref[...] += partial.reshape(1, SUBLANES, LANES)

    if need_mask:
        gb = c * blocks_per_core + k            # unclamped global block id
        is_edge = (gb + 1) * block_rows > rows  # block extends past real data

        # Steady-state path: no mask work at all.
        @pl.when(jnp.logical_not(is_edge))
        def _():
            _accumulate(dd)

        # Edge / overhang path: mask rows past the end of the real data.
        # NOTE: mask uses the UNCLAMPED global block id and is applied after
        # d*d, so garbage (even NaN/Inf) read past the array end is discarded.
        @pl.when(is_edge)
        def _():
            row_ids = jax.lax.broadcasted_iota(jnp.int32, dd.shape, 0)
            valid = (gb * block_rows + row_ids) < rows
            _accumulate(jnp.where(valid, dd, 0.0))
    else:
        _accumulate(dd)


def mse_loss_pallas(inp, target):
    """Equivalent of F.mse_loss(input, target) with reduction='mean'."""
    assert inp.shape == target.shape, "mse expects matching shapes"
    n = inp.size

    # Flatten (free). Mixed dtypes are promoted to f32 in-kernel.
    x = inp.reshape(-1)
    y = target.reshape(-1)

    # 128-aligned prefix goes through the kernel; the (<128-element) tail is a
    # tiny plain-jnp sum of squares. No full-tensor pad copy.
    n_main = (n // LANES) * LANES
    tail_sum = None
    if n_main != n:
        tx = x[n_main:].astype(jnp.float32)
        ty = y[n_main:].astype(jnp.float32)
        dt = tx - ty
        tail_sum = jnp.sum(dt * dt)
        x = x[:n_main]
        y = y[:n_main]

    rows = n_main // LANES

    # Tiny-input fallback: not worth a kernel launch, and keeps block_rows a
    # multiple of 8 on the kernel path.
    if rows < SUBLANES:
        dx = x.astype(jnp.float32) - y.astype(jnp.float32)
        total = jnp.sum(dx * dx)
        if tail_sum is not None:
            total = total + tail_sum
        return total / n

    x2 = x.reshape(rows, LANES)
    y2 = y.reshape(rows, LANES)

    # Dtype-aware block size targeting ~4 MiB per input block.
    itemsize = max(x2.dtype.itemsize, y2.dtype.itemsize)
    block_rows_cap = max(SUBLANES, TARGET_BLOCK_BYTES // (LANES * itemsize))
    block_rows = min(block_rows_cap, (rows // SUBLANES) * SUBLANES)
    num_blocks = _cdiv(rows, block_rows)

    # 2-core split only where it is real (v7x); pure overhead on v5e/v6e.
    ncores = max(1, min(_num_tensorcores(), num_blocks))
    blocks_per_core = _cdiv(num_blocks, ncores)
    # Mask needed iff some grid step covers rows beyond the real data
    # (partial last block, or clamped duplicate blocks on the second core).
    need_mask = (ncores * blocks_per_core * block_rows) != rows

    def in_index_map(c, k):
        gb = c * blocks_per_core + k
        # Clamp out-of-range blocks (second core's overhang); the kernel masks
        # their contribution to zero.
        return (jnp.minimum(gb, num_blocks - 1), 0)

    kernel = functools.partial(
        _mse_kernel, rows=rows, block_rows=block_rows,
        blocks_per_core=blocks_per_core, need_mask=need_mask)

    # VMEM budget: double-buffered x + y blocks, plus slack for output blocks
    # and compiler scratch. Explicit so bigger blocks still pipeline on v5e
    # (16 MiB scoped default) and stay well inside v7x's 64 MiB physical VMEM.
    in_block_bytes = block_rows * LANES * (x2.dtype.itemsize + y2.dtype.itemsize)
    vmem_limit = int(min(2 * in_block_bytes + (4 << 20), 48 << 20))

    if ncores == 2:
        dim_sems = (pltpu.CORE_PARALLEL, pltpu.ARBITRARY)
    else:
        dim_sems = (pltpu.ARBITRARY, pltpu.ARBITRARY)

    bytes_accessed = int(x2.size * x2.dtype.itemsize
                         + y2.size * y2.dtype.itemsize
                         + ncores * SUBLANES * LANES * 4)

    out = pl.pallas_call(
        kernel,
        out_shape=jax.ShapeDtypeStruct((ncores, SUBLANES, LANES), jnp.float32),
        grid_spec=pltpu.PrefetchScalarGridSpec(
            num_scalar_prefetch=0,
            grid=(ncores, blocks_per_core),
            in_specs=[
                pl.BlockSpec((block_rows, LANES), in_index_map),
                pl.BlockSpec((block_rows, LANES), in_index_map),
            ],
            out_specs=pl.BlockSpec((1, SUBLANES, LANES),
                                   lambda c, k: (c, 0, 0)),
        ),
        compiler_params=pltpu.CompilerParams(
            dimension_semantics=dim_sems,
            vmem_limit_bytes=vmem_limit,
        ),
        cost_estimate=pl.CostEstimate(
            flops=3 * n, transcendentals=0, bytes_accessed=bytes_accessed),
    )(x2, y2)

    # Single cheap cross-lane reduce + divide by the true element count.
    total = jnp.sum(out)
    if tail_sum is not None:
        total = total + tail_sum
    return total / n


if __name__ == "__main__":
    key = jax.random.PRNGKey(0)
    k1, k2 = jax.random.split(key)

    # NCHW inputs as the PyTorch module would see them.
    x = jax.random.normal(k1, (2, 4, 16, 16), dtype=jnp.float32)
    t = jax.random.normal(k2, (2, 4, 16, 16), dtype=jnp.float32)
    loss = jax.block_until_ready(mse_loss_pallas(x, t))
    ref = jnp.mean((x - t) ** 2)
    assert jnp.allclose(loss, ref, rtol=1e-5, atol=1e-6), (loss, ref)

    # Ragged shape: exercises the edge-block mask and the <128-element tail.
    k3, k4 = jax.random.split(k2)
    xr = jax.random.normal(k3, (3, 5, 17, 13), dtype=jnp.float32)
    tr = jax.random.normal(k4, (3, 5, 17, 13), dtype=jnp.float32)
    lr = jax.block_until_ready(mse_loss_pallas(xr, tr))
    refr = jnp.mean((xr - tr) ** 2)
    assert jnp.allclose(lr, refr, rtol=1e-5, atol=1e-6), (lr, refr)

    print("KERNEL_OK")
</pallas_src>

<mosaic_0001>
module attributes {stable_mosaic.version = 11 : i64} {
  func.func @_mse_kernel(%arg0: i32, %arg1: i32, %arg2: memref<16x128xf32, #tpu.memory_space<vmem>>, %arg3: memref<16x128xf32, #tpu.memory_space<vmem>>, %arg4: memref<1x8x128xf32, #tpu.memory_space<vmem>>) attributes {dimension_semantics = [#tpu.dimension_semantics<arbitrary>, #tpu.dimension_semantics<arbitrary>], iteration_bounds = array<i64: 1, 1>, scalar_prefetch = 0 : i64, scratch_operands = 0 : i64, tpu.core_type = #tpu.core_type<tc>, window_params = [{transform_indices = @transform_0, window_bounds = array<i64: 16, 128>}, {transform_indices = @transform_1, window_bounds = array<i64: 16, 128>}, {transform_indices = @transform_2, window_bounds = array<i64: 1, 8, 128>}]} {
    %c0_i32 = arith.constant 0 : i32
    %0 = arith.cmpi eq, %arg1, %c0_i32 : i32
    %1 = arith.extui %0 : i1 to i32
    %c0_i32_0 = arith.constant 0 : i32
    %2 = arith.cmpi ne, %1, %c0_i32_0 : i32
    scf.if %2 {
      %cst_10 = arith.constant 0.000000e+00 : f32
      %13 = vector.broadcast %cst_10 : f32 to vector<1x8x128xf32>
      %c0_11 = arith.constant 0 : index
      %c0_12 = arith.constant 0 : index
      %c0_13 = arith.constant 0 : index
      %14 = vector.load %arg4[%c0_11, %c0_12, %c0_13] : memref<1x8x128xf32, #tpu.memory_space<vmem>>, vector<1x8x128xf32>
      tpu.vector_store %arg4[%c0_11, %c0_12, %c0_13], %13 {strides = array<i32>} : memref<1x8x128xf32, #tpu.memory_space<vmem>>, vector<1x8x128xf32>,
    } else {
    }
    %c0 = arith.constant 0 : index
    %c0_1 = arith.constant 0 : index
    %3 = vector.load %arg2[%c0, %c0_1] : memref<16x128xf32, #tpu.memory_space<vmem>>, vector<16x128xf32>
    %c0_2 = arith.constant 0 : index
    %c0_3 = arith.constant 0 : index
    %4 = vector.load %arg3[%c0_2, %c0_3] : memref<16x128xf32, #tpu.memory_space<vmem>>, vector<16x128xf32>
    %5 = arith.subf %3, %4 : vector<16x128xf32>
    %6 = arith.mulf %5, %5 : vector<16x128xf32>
    %7 = vector.shape_cast %6 : vector<16x128xf32> to vector<2x8x128xf32>
    %cst = arith.constant dense<0.000000e+00> : vector<8x128xf32>
    %8 = vector.multi_reduction <add>, %7, %cst [0] : vector<2x8x128xf32> to vector<8x128xf32>
    %c0_4 = arith.constant 0 : index
    %c0_5 = arith.constant 0 : index
    %c0_6 = arith.constant 0 : index
    %9 = vector.load %arg4[%c0_4, %c0_5, %c0_6] : memref<1x8x128xf32, #tpu.memory_space<vmem>>, vector<1x8x128xf32>
    %10 = vector.shape_cast %8 : vector<8x128xf32> to vector<1x8x128xf32>
    %11 = arith.addf %9, %10 : vector<1x8x128xf32>
    %c0_7 = arith.constant 0 : index
    %c0_8 = arith.constant 0 : index
    %c0_9 = arith.constant 0 : index
    %12 = vector.load %arg4[%c0_7, %c0_8, %c0_9] : memref<1x8x128xf32, #tpu.memory_space<vmem>>, vector<1x8x128xf32>
    tpu.vector_store %arg4[%c0_7, %c0_8, %c0_9], %11 {strides = array<i32>} : memref<1x8x128xf32, #tpu.memory_space<vmem>>, vector<1x8x128xf32>,
    return
  }
  func.func @transform_0(%arg0: i32, %arg1: i32) -> (i32, i32) {
    %c1_i32 = arith.constant 1 : i32
    %0 = arith.muli %arg0, %c1_i32 : i32
    %1 = arith.addi %0, %arg1 : i32
    %c0_i32 = arith.constant 0 : i32
    %2 = arith.minsi %1, %c0_i32 : i32
    %c0_i32_0 = arith.constant 0 : i32
    %c0_i32_1 = arith.constant 0 : i32
    return %2, %c0_i32_0 : i32, i32
  }
  func.func @transform_1(%arg0: i32, %arg1: i32) -> (i32, i32) {
    %c1_i32 = arith.constant 1 : i32
    %0 = arith.muli %arg0, %c1_i32 : i32
    %1 = arith.addi %0, %arg1 : i32
    %c0_i32 = arith.constant 0 : i32
    %2 = arith.minsi %1, %c0_i32 : i32
    %c0_i32_0 = arith.constant 0 : i32
    %c0_i32_1 = arith.constant 0 : i32
    return %2, %c0_i32_0 : i32, i32
  }
  func.func @transform_2(%arg0: i32, %arg1: i32) -> (i32, i32, i32) {
    %c0_i32 = arith.constant 0 : i32
    %c0_i32_0 = arith.constant 0 : i32
    %c0_i32_1 = arith.constant 0 : i32
    return %arg0, %c0_i32, %c0_i32_0 : i32, i32, i32
  }
}

</mosaic_0001>

<bundles_post_ra>
// kernel: tpu_custom_call.1
= control target key start
LH: loop header
LB: loop body
LE: loop exit
PB: predicated region body
PF: predicated region fallthrough
CT: control target
= control target key end

     0   :  { %7 = vsyncpa [#allocation3], 0  ;;  %s198_s0 = inlined_call_operand.hbm [shape: f32[16,128], index: 0, kind: input, shape index: {}]   ;;  %s199_s1 = inlined_call_operand.hbm [shape: f32[16,128], index: 1, kind: input, shape index: {}]   ;;  %s200_s2 = inlined_call_operand.hbm [shape: f32[1,8,128], index: 2, kind: output, shape index: {}]  }
   0x1   :  { %8 = vsyncpa [#allocation6], 0 }
   0x2   :  { %9 = vsyncpa [#allocation4], 0  ;;  %s169_s9 = smov [#allocation2]  }
   0x3   :  { %s21_s10 = sshll.u32 %s169_s9, 4  ;;  %s22_s10 = int_to_ptr.vmem [resolvable:$true] %s21_s10 }
   0x4   :  { %s111_s11 = scalar_lea.vmem %s22_s10, 256  ;;  %p116_p1 = scmp.lt.s32.totalorder %s22_s10, %s22_s10 }
   0x5   :  { %p112_p0 = scmp.ne.s32.totalorder %s22_s10, %s111_s11  ;;  %p117_p2 = scmp.lt.s32.totalorder %s111_s11, %s111_s11 }
   0x7   :  { %p118_p3 = por %p117_p2, %p116_p1 }
   0x9   :  { %p119_p4 = pnand %p118_p3, %p112_p0 }
   0xb   :  { %122 = shalt.err (!%p119_p4)
}
   0xc   :  { %s170_s12 = smov 128   ;;  %s171_s13 = smov 8  }
   0xd   :  { %27 = dma.hbm_to_vmem [thread:$0]  %s198_s0, 256, %s22_s10, [#allocation3], %s170_s12, %s170_s12, %s171_s13  }
   0xe   :  { %s172_s16 = smov [#allocation5]  }
   0xf   :  { %s39_s17 = sshll.u32 %s172_s16, 4  ;;  %s40_s17 = int_to_ptr.vmem [resolvable:$true] %s39_s17 }
  0x10   :  { %s131_s18 = scalar_lea.vmem %s40_s17, 256  ;;  %p136_p6 = scmp.lt.s32.totalorder %s40_s17, %s40_s17 }
  0x11   :  { %p132_p5 = scmp.ne.s32.totalorder %s40_s17, %s131_s18  ;;  %p137_p7 = scmp.lt.s32.totalorder %s131_s18, %s131_s18 }
  0x13   :  { %p138_p8 = por %p137_p7, %p136_p6 }
  0x15   :  { %p139_p9 = pnand %p138_p8, %p132_p5 }
  0x17   :  { %142 = shalt.err (!%p139_p9)
}
  0x18   :  { %45 = dma.hbm_to_vmem [thread:$0]  %s199_s1, 256, %s40_s17, [#allocation6], %s170_s12, %s170_s12, %s171_s13  }
  0x19   :  { %163 = dma.done.wait [#allocation3], 256  }
  0x1a   :  { %164 = vsyncadd [#allocation3], 4294967040 }
  0x1b   :  { %165 = dma.done.wait [#allocation6], 256  }
  0x1c   :  { %166 = vsyncadd [#allocation6], 4294967040  ;;  %v65_v0 = vld [vmem:[#allocation2] sm:$0xff]  ;;  %v66_v1 = vld [vmem:[#allocation2 + $0x8] sm:$0xff]  ;;  %s173_s0 = smov [#allocation7]  }
  0x1d   :  { %v67_v2 = vld [vmem:[#allocation5] sm:$0xff]  ;;  %v68_v3 = vld [vmem:[#allocation5 + $0x8] sm:$0xff]  ;;  %s83_s21 = sshll.u32 %s173_s0, 4  ;;  %s84_s21 = int_to_ptr.vmem [resolvable:$true] %s83_s21 }
  0x1e   :  { %v69_v4 = vsub.f32 %v65_v0, %v67_v2  ;;  %v70_v5 = vsub.f32 %v66_v1, %v68_v3  ;;  %s143_s22 = scalar_lea.vmem %s84_s21, 128  ;;  %p148_p11 = scmp.lt.s32.totalorder %s84_s21, %s84_s21 }
  0x1f   :  { %p144_p10 = scmp.ne.s32.totalorder %s84_s21, %s143_s22  ;;  %p149_p12 = scmp.lt.s32.totalorder %s143_s22, %s143_s22 }
  0x20   :  { %v71_v6 = vmul.f32 %v69_v4, %v69_v4  ;;  %v72_v7 = vmul.f32 %v70_v5, %v70_v5 }
  0x21   :  { %p150_p13 = por %p149_p12, %p148_p11 }
  0x22   :  { %v73_v8 = vadd.f32 %v72_v7, %v71_v6 }
  0x23   :  { %p151_p0 = pnand %p150_p13, %p144_p10 }
  0x24   :  { %76 = vst [vmem:[#allocation7] sm:$0xff] %v73_v8 }
  0x25   :  { %154 = shalt.err (!%p151_p0)
}
  0x26   :  { %86 = dma.vmem_to_hbm [thread:$0]  %s84_s21, 128, %s200_s2, [#allocation4]  }
  0x27   :  { %167 = dma.done.wait [#allocation4], 128  }
  0x28   :  { %168 = vsyncadd [#allocation4], 4294967168 }
  0x29   :  { %90 = vsyncpa [#allocation3], 1 }
  0x2a   :  { %91 = vsyncpa [#allocation6], 1 }
  0x2b   :  { %92 = vsyncpa [#allocation4], 1 }

</bundles_post_ra>
